<compile_context>
chip_gen: v7x
topology: tpu7x:2x2x1
jax: 0.10.0
libtpu: 0.0.40
codegen_flags: <defaults>
</compile_context>

<pallas_src>
import jax
import jax.numpy as jnp
from jax.experimental import pallas as pl
from jax.experimental.pallas import tpu as pltpu


_SUBLANE = {4: 8, 2: 16, 1: 32}   # itemsize -> sublane packing of a vreg


def _round_up(x, m):
    return ((x + m - 1) // m) * m


def _pad2(a, rows, cols):
    pr, pc = rows - a.shape[0], cols - a.shape[1]
    if pr or pc:
        a = jnp.pad(a, ((0, pr), (0, pc)))
    return a


def _pick_tb(batch, block_b, sublane):
    """Batch-tile rows: sublane-aligned, MXU-friendly, >=2 grid steps when big."""
    tb = min(block_b, _round_up(batch, sublane))
    if batch >= 512:
        # Cap the tile so the grid has at least 2 steps: lets the two v7x
        # TensorCores / v6e megacore halves each take a share of the batch.
        tb = min(tb, _round_up(pl.cdiv(batch, 2), sublane))
    if tb >= 256:
        tb = (tb // 256) * 256     # v6e/v7x MXU M-tile (2x256x256)
    elif tb >= 128:
        tb = (tb // 128) * 128     # 128 already saturates v5e's 4x128x128 MXU
    else:
        tb = _round_up(tb, sublane)
    return max(tb, sublane)


def _head_kernel(x_ref, w1_ref, b1_ref, w2_ref, b2_ref, o_ref):
    # x_ref:  [TB, H(_pad)]   CLS-token feature tile
    # w1_ref: [H_pad, H_pad]  dense weight ([in, out]), VMEM-resident
    # b1_ref: [1, H_pad]      dense bias (f32)
    # w2_ref: [H_pad, L_pad]  out_proj weight, VMEM-resident
    # b2_ref: [1, L_pad]      out_proj bias (f32)
    # o_ref:  [TB, L_pad]     logits tile (lane-dense)
    x = x_ref[...]
    if x.dtype != w1_ref.dtype:          # feed the MXU in the weight dtype (bf16)
        x = x.astype(w1_ref.dtype)
    h = jnp.dot(x, w1_ref[...], preferred_element_type=jnp.float32)
    h = jnp.tanh(h + b1_ref[...])        # f32 bias-add / tanh epilogue
    out = jnp.dot(h.astype(w2_ref.dtype), w2_ref[...],
                  preferred_element_type=jnp.float32)
    out = out + b2_ref[...]
    o_ref[...] = out.astype(o_ref.dtype)


def roberta_classification_head(features, w_dense, b_dense, w_out, b_out, *,
                                block_b=None, mxu_dtype=jnp.bfloat16,
                                out_dtype=jnp.float32):
    """RoBERTa classification head forward (eval mode).

    features: [B, S, H]; Linear weights stored as [in, out] ([H,H] and [H,L]).
    Returns logits [B, num_labels] in `out_dtype` (f32 by default).

    mxu_dtype: dtype fed to the MXU (weights stored in it; activations cast in
      kernel).  Default bf16 gives ~3-8x matmul throughput for f32 inputs with
      f32 accumulation (bf16-level accuracy); pass None for exact f32 math.
    """
    B, S, H = features.shape
    L = w_out.shape[1]
    H_pad = _round_up(H, 128)
    L_pad = _round_up(L, 128)

    x_dtype = jnp.dtype(features.dtype)
    sublane = _SUBLANE.get(x_dtype.itemsize, 8)
    if block_b is None:
        block_b = 512 if B >= 1024 else 256
    tb = _pick_tb(B, block_b, sublane)

    # Weight dtype fed to the MXU: downcast f32 -> bf16 by default, never upcast.
    w_dt = jnp.dtype(w_dense.dtype)
    if mxu_dtype is not None and jnp.dtype(mxu_dtype).itemsize < w_dt.itemsize:
        w_dt = jnp.dtype(mxu_dtype)

    # Zero padding keeps the math exact; biases stay in f32 for the epilogue.
    w1 = _pad2(w_dense.astype(w_dt), H_pad, H_pad)
    w2 = _pad2(w_out.astype(w_dt), H_pad, L_pad)
    b1 = _pad2(b_dense.astype(jnp.float32).reshape(1, H), 1, H_pad)
    b2 = _pad2(b_out.astype(jnp.float32).reshape(1, L), 1, L_pad)

    if H % 128 == 0:
        # Fold the CLS slice into the BlockSpec: [B,S,H] -> [B,S*H] is a free
        # row-major reshape and each x block reads columns [0:H] of its rows.
        # A ragged batch is handled by Pallas edge masking on the last tile.
        x_arr = features.reshape(B, S * H)
        x_cols = H
    else:
        # Unaligned H (e.g. the tiny test config): slice the CLS token and pad.
        x_arr = _pad2(features[:, 0, :], _round_up(B, sublane), H_pad)
        x_cols = H_pad

    rows = x_arr.shape[0]
    grid = (pl.cdiv(rows, tb),)

    x_item = x_dtype.itemsize
    w_item = w_dt.itemsize
    out_item = jnp.dtype(out_dtype).itemsize

    flops = 2 * rows * H_pad * (H_pad + L_pad)
    bytes_accessed = (rows * x_cols * x_item
                      + (H_pad * H_pad + H_pad * L_pad) * w_item
                      + (H_pad + L_pad) * 4
                      + rows * L_pad * out_item)

    def _vmem_limit(w_bufs):
        need = (2 * tb * x_cols * x_item                           # x tiles (2-buffered)
                + w_bufs * (H_pad * H_pad + H_pad * L_pad) * w_item  # weights
                + w_bufs * 8 * (H_pad + L_pad) * 4                 # biases (sublane-padded)
                + 2 * tb * L_pad * out_item                        # out tiles (2-buffered)
                + tb * H_pad * (2 * 4 + 2 * w_item)                # f32 h/tanh + casts
                + tb * L_pad * 4)                                  # f32 out before cast
        return max(min(need * 3 // 2 + (4 << 20), 128 << 20), 16 << 20)

    def _call(resident_kwargs, w_bufs):
        in_specs = [
            pl.BlockSpec((tb, x_cols), lambda i: (i, 0)),
            pl.BlockSpec((H_pad, H_pad), lambda i: (0, 0), **resident_kwargs),
            pl.BlockSpec((1, H_pad), lambda i: (0, 0), **resident_kwargs),
            pl.BlockSpec((H_pad, L_pad), lambda i: (0, 0), **resident_kwargs),
            pl.BlockSpec((1, L_pad), lambda i: (0, 0), **resident_kwargs),
        ]
        return pl.pallas_call(
            _head_kernel,
            out_shape=jax.ShapeDtypeStruct((rows, L_pad), out_dtype),
            grid=grid,
            in_specs=in_specs,
            out_specs=pl.BlockSpec((tb, L_pad), lambda i: (i, 0)),
            compiler_params=pltpu.CompilerParams(
                dimension_semantics=("parallel",),
                vmem_limit_bytes=int(_vmem_limit(w_bufs))),
            cost_estimate=pl.CostEstimate(
                flops=int(flops),
                transcendentals=int(rows * H_pad),
                bytes_accessed=int(bytes_accessed)),
        )(x_arr, w1, b1, w2, b2)

    try:
        # Constant-index weights/biases only need a single VMEM buffer.
        out = _call(dict(pipeline_mode=pl.Buffered(1)), w_bufs=1)
    except Exception:
        # Fallback for jax builds without BlockSpec.pipeline_mode support:
        # default double buffering (correctness identical, more VMEM).
        out = _call({}, w_bufs=2)

    return out[:B, :L]


def reference_f32(features, w_dense, b_dense, w_out, b_out):
    x = features[:, 0, :].astype(jnp.float32)
    h = jnp.tanh(x @ w_dense.astype(jnp.float32) + b_dense.astype(jnp.float32))
    return h @ w_out.astype(jnp.float32) + b_out.astype(jnp.float32)


def reference_mxu(features, w_dense, b_dense, w_out, b_out,
                  mxu_dtype=jnp.bfloat16):
    # Mimics the kernel's mixed precision: bf16 MXU feed, f32 accumulation.
    x = features[:, 0, :].astype(mxu_dtype)
    h = jnp.dot(x, w_dense.astype(mxu_dtype),
                preferred_element_type=jnp.float32)
    h = jnp.tanh(h + b_dense.astype(jnp.float32))
    out = jnp.dot(h.astype(mxu_dtype), w_out.astype(mxu_dtype),
                  preferred_element_type=jnp.float32)
    return out + b_out.astype(jnp.float32)


def _make_inputs(key, B, S, H, L, dtype=jnp.float32):
    k_feat, k_w1, k_b1, k_w2, k_b2 = jax.random.split(key, 5)
    features = jax.random.normal(k_feat, (B, S, H), dtype=dtype)
    w_dense = jax.random.normal(k_w1, (H, H), dtype=dtype) * (1.0 / H ** 0.5)
    b_dense = jax.random.normal(k_b1, (H,), dtype=dtype) * 0.01
    w_out = jax.random.normal(k_w2, (H, L), dtype=dtype) * (1.0 / H ** 0.5)
    b_out = jax.random.normal(k_b2, (L,), dtype=dtype) * 0.01
    return features, w_dense, b_dense, w_out, b_out


if __name__ == "__main__":
    key = jax.random.PRNGKey(0)
    k_small, k_big = jax.random.split(key)

    # 1) Small config consistent with the module (hidden_size=32, num_labels=4)
    #    on the unaligned-H padded path, exact f32 math (mxu_dtype=None).
    B, S, H, L = 2, 8, 32, 4
    args = _make_inputs(k_small, B, S, H, L)
    exact = jax.block_until_ready(
        roberta_classification_head(*args, mxu_dtype=None))
    ref = reference_f32(*args)
    assert exact.shape == (B, L), exact.shape
    assert jnp.allclose(exact, ref, atol=1e-5, rtol=1e-5), (
        f"f32 path max abs err {jnp.max(jnp.abs(exact - ref))}")

    # 2) Same config with the default bf16 MXU feed: matches a bf16-mimicking
    #    reference tightly and the f32 reference to bf16 tolerance.
    fast = jax.block_until_ready(roberta_classification_head(*args))
    ref_mxu = reference_mxu(*args)
    assert fast.shape == (B, L), fast.shape
    assert jnp.allclose(fast, ref_mxu, atol=2e-3, rtol=2e-3), (
        f"bf16 path max abs err {jnp.max(jnp.abs(fast - ref_mxu))}")
    assert jnp.allclose(fast, ref, atol=1e-1, rtol=1e-1)

    # 3) 128-aligned H with a ragged batch (B=20, block_b=8): exercises the
    #    in-BlockSpec CLS slice, a multi-step grid with single-buffered
    #    resident weights, and Pallas edge masking of the last batch tile.
    B2, S2, H2, L2 = 20, 8, 128, 4
    args2 = _make_inputs(k_big, B2, S2, H2, L2)
    logits2 = jax.block_until_ready(
        roberta_classification_head(*args2, block_b=8))
    assert logits2.shape == (B2, L2), logits2.shape
    ref2_mxu = reference_mxu(*args2)
    ref2 = reference_f32(*args2)
    assert jnp.allclose(logits2, ref2_mxu, atol=2e-3, rtol=2e-3), (
        f"max abs err {jnp.max(jnp.abs(logits2 - ref2_mxu))}")
    assert jnp.allclose(logits2, ref2, atol=1e-1, rtol=1e-1)

    print("KERNEL_OK")
</pallas_src>

<mosaic_0001>
module attributes {stable_mosaic.version = 11 : i64} {
  func.func @_head_kernel(%arg0: i32, %arg1: memref<8x128xf32, #tpu.memory_space<vmem>>, %arg2: memref<128x128xf32, #tpu.memory_space<vmem>>, %arg3: memref<1x128xf32, #tpu.memory_space<vmem>>, %arg4: memref<128x128xf32, #tpu.memory_space<vmem>>, %arg5: memref<1x128xf32, #tpu.memory_space<vmem>>, %arg6: memref<8x128xf32, #tpu.memory_space<vmem>>) attributes {dimension_semantics = [#tpu.dimension_semantics<parallel>], iteration_bounds = array<i64: 1>, scalar_prefetch = 0 : i64, scratch_operands = 0 : i64, tpu.core_type = #tpu.core_type<tc>, window_params = [{transform_indices = @transform_0, window_bounds = array<i64: 8, 128>}, {pipeline_mode = #tpu.pipeline_mode<synchronous>, transform_indices = @transform_1, window_bounds = array<i64: 128, 128>}, {pipeline_mode = #tpu.pipeline_mode<synchronous>, transform_indices = @transform_2, window_bounds = array<i64: 1, 128>}, {pipeline_mode = #tpu.pipeline_mode<synchronous>, transform_indices = @transform_3, window_bounds = array<i64: 128, 128>}, {pipeline_mode = #tpu.pipeline_mode<synchronous>, transform_indices = @transform_4, window_bounds = array<i64: 1, 128>}, {transform_indices = @transform_5, window_bounds = array<i64: 8, 128>}]} {
    %c0 = arith.constant 0 : index
    %c0_0 = arith.constant 0 : index
    %0 = vector.load %arg1[%c0, %c0_0] : memref<8x128xf32, #tpu.memory_space<vmem>>, vector<8x128xf32>
    %c0_1 = arith.constant 0 : index
    %c0_2 = arith.constant 0 : index
    %1 = vector.load %arg2[%c0_1, %c0_2] : memref<128x128xf32, #tpu.memory_space<vmem>>, vector<128x128xf32>
    %cst = arith.constant dense<0.000000e+00> : vector<8x128xf32>
    %2 = tpu.matmul %0, %1, %cst {dimension_numbers = #tpu.dot_dimension_numbers<[1], [0], [0], [1], [0, 0, 1, 1], [], []>} : vector<8x128xf32>, vector<128x128xf32>, vector<8x128xf32> -> vector<8x128xf32>
    %c0_3 = arith.constant 0 : index
    %c0_4 = arith.constant 0 : index
    %3 = vector.load %arg3[%c0_3, %c0_4] : memref<1x128xf32, #tpu.memory_space<vmem>>, vector<1x128xf32>
    %4 = vector.broadcast %3 : vector<1x128xf32> to vector<8x128xf32>
    %5 = arith.addf %2, %4 : vector<8x128xf32>
    %6 = math.tanh %5 : vector<8x128xf32>
    %c0_5 = arith.constant 0 : index
    %c0_6 = arith.constant 0 : index
    %7 = vector.load %arg4[%c0_5, %c0_6] : memref<128x128xf32, #tpu.memory_space<vmem>>, vector<128x128xf32>
    %cst_7 = arith.constant dense<0.000000e+00> : vector<8x128xf32>
    %8 = tpu.matmul %6, %7, %cst_7 {dimension_numbers = #tpu.dot_dimension_numbers<[1], [0], [0], [1], [0, 0, 1, 1], [], []>} : vector<8x128xf32>, vector<128x128xf32>, vector<8x128xf32> -> vector<8x128xf32>
    %c0_8 = arith.constant 0 : index
    %c0_9 = arith.constant 0 : index
    %9 = vector.load %arg5[%c0_8, %c0_9] : memref<1x128xf32, #tpu.memory_space<vmem>>, vector<1x128xf32>
    %10 = vector.broadcast %9 : vector<1x128xf32> to vector<8x128xf32>
    %11 = arith.addf %8, %10 : vector<8x128xf32>
    %c0_10 = arith.constant 0 : index
    %c0_11 = arith.constant 0 : index
    %12 = vector.load %arg6[%c0_10, %c0_11] : memref<8x128xf32, #tpu.memory_space<vmem>>, vector<8x128xf32>
    tpu.vector_store %arg6[%c0_10, %c0_11], %11 {strides = array<i32>} : memref<8x128xf32, #tpu.memory_space<vmem>>, vector<8x128xf32>,
    return
  }
  func.func @transform_0(%arg0: i32) -> (i32, i32) {
    %c0_i32 = arith.constant 0 : i32
    %c0_i32_0 = arith.constant 0 : i32
    return %arg0, %c0_i32 : i32, i32
  }
  func.func @transform_1(%arg0: i32) -> (i32, i32) {
    %c0_i32 = arith.constant 0 : i32
    %c0_i32_0 = arith.constant 0 : i32
    %c0_i32_1 = arith.constant 0 : i32
    return %c0_i32, %c0_i32_0 : i32, i32
  }
  func.func @transform_2(%arg0: i32) -> (i32, i32) {
    %c0_i32 = arith.constant 0 : i32
    %c0_i32_0 = arith.constant 0 : i32
    %c0_i32_1 = arith.constant 0 : i32
    return %c0_i32, %c0_i32_0 : i32, i32
  }
  func.func @transform_3(%arg0: i32) -> (i32, i32) {
    %c0_i32 = arith.constant 0 : i32
    %c0_i32_0 = arith.constant 0 : i32
    %c0_i32_1 = arith.constant 0 : i32
    return %c0_i32, %c0_i32_0 : i32, i32
  }
  func.func @transform_4(%arg0: i32) -> (i32, i32) {
    %c0_i32 = arith.constant 0 : i32
    %c0_i32_0 = arith.constant 0 : i32
    %c0_i32_1 = arith.constant 0 : i32
    return %c0_i32, %c0_i32_0 : i32, i32
  }
  func.func @transform_5(%arg0: i32) -> (i32, i32) {
    %c0_i32 = arith.constant 0 : i32
    %c0_i32_0 = arith.constant 0 : i32
    return %arg0, %c0_i32 : i32, i32
  }
}

module attributes {stable_mosaic.version = 11 : i64} {
  func.func @_head_kernel(%arg0: i32, %arg1: memref<8x128xf32, #tpu.memory_space<vmem>>, %arg2: memref<128x128xf32, #tpu.memory_space<vmem>>, %arg3: memref<1x128xf32, #tpu.memory_space<vmem>>, %arg4: memref<128x128xf32, #tpu.memory_space<vmem>>, %arg5: memref<1x128xf32, #tpu.memory_space<vmem>>, %arg6: memref<8x128xf32, #tpu.memory_space<vmem>>) attributes {dimension_semantics = [#tpu.dimension_semantics<parallel>], iteration_bounds = array<i64: 1>, scalar_prefetch = 0 : i64, scratch_operands = 0 : i64, tpu.core_type = #tpu.core_type<tc>, window_params = [{transform_indices = @transform_0, window_bounds = array<i64: 8, 128>}, {pipeline_mode = #tpu.pipeline_mode<synchronous>, transform_indices = @transform_1, window_bounds = array<i64: 128, 128>}, {pipeline_mode = #tpu.pipeline_mode<synchronous>, transform_indices = @transform_2, window_bounds = array<i64: 1, 128>}, {pipeline_mode = #tpu.pipeline_mode<synchronous>, transform_indices = @transform_3, window_bounds = array<i64: 128, 128>}, {pipeline_mode = #tpu.pipeline_mode<synchronous>, transform_indices = @transform_4, window_bounds = array<i64: 1, 128>}, {transform_indices = @transform_5, window_bounds = array<i64: 8, 128>}]} {
    %c0 = arith.constant 0 : index
    %c0_0 = arith.constant 0 : index
    %0 = vector.load %arg1[%c0, %c0_0] : memref<8x128xf32, #tpu.memory_space<vmem>>, vector<8x128xf32>
    %c0_1 = arith.constant 0 : index
    %c0_2 = arith.constant 0 : index
    %1 = vector.load %arg2[%c0_1, %c0_2] : memref<128x128xf32, #tpu.memory_space<vmem>>, vector<128x128xf32>
    %cst = arith.constant dense<0.000000e+00> : vector<8x128xf32>
    %2 = tpu.matmul %0, %1, %cst {dimension_numbers = #tpu.dot_dimension_numbers<[1], [0], [0], [1], [0, 0, 1, 1], [], []>} : vector<8x128xf32>, vector<128x128xf32>, vector<8x128xf32> -> vector<8x128xf32>
    %c0_3 = arith.constant 0 : index
    %c0_4 = arith.constant 0 : index
    %3 = vector.load %arg3[%c0_3, %c0_4] : memref<1x128xf32, #tpu.memory_space<vmem>>, vector<1x128xf32>
    %4 = vector.broadcast %3 : vector<1x128xf32> to vector<8x128xf32>
    %5 = arith.addf %2, %4 : vector<8x128xf32>
    %6 = math.tanh %5 : vector<8x128xf32>
    %c0_5 = arith.constant 0 : index
    %c0_6 = arith.constant 0 : index
    %7 = vector.load %arg4[%c0_5, %c0_6] : memref<128x128xf32, #tpu.memory_space<vmem>>, vector<128x128xf32>
    %cst_7 = arith.constant dense<0.000000e+00> : vector<8x128xf32>
    %8 = tpu.matmul %6, %7, %cst_7 {dimension_numbers = #tpu.dot_dimension_numbers<[1], [0], [0], [1], [0, 0, 1, 1], [], []>} : vector<8x128xf32>, vector<128x128xf32>, vector<8x128xf32> -> vector<8x128xf32>
    %c0_8 = arith.constant 0 : index
    %c0_9 = arith.constant 0 : index
    %9 = vector.load %arg5[%c0_8, %c0_9] : memref<1x128xf32, #tpu.memory_space<vmem>>, vector<1x128xf32>
    %10 = vector.broadcast %9 : vector<1x128xf32> to vector<8x128xf32>
    %11 = arith.addf %8, %10 : vector<8x128xf32>
    %c0_10 = arith.constant 0 : index
    %c0_11 = arith.constant 0 : index
    %12 = vector.load %arg6[%c0_10, %c0_11] : memref<8x128xf32, #tpu.memory_space<vmem>>, vector<8x128xf32>
    tpu.vector_store %arg6[%c0_10, %c0_11], %11 {strides = array<i32>} : memref<8x128xf32, #tpu.memory_space<vmem>>, vector<8x128xf32>,
    return
  }
  func.func @transform_0(%arg0: i32) -> (i32, i32) {
    %c0_i32 = arith.constant 0 : i32
    %c0_i32_0 = arith.constant 0 : i32
    return %arg0, %c0_i32 : i32, i32
  }
  func.func @transform_1(%arg0: i32) -> (i32, i32) {
    %c0_i32 = arith.constant 0 : i32
    %c0_i32_0 = arith.constant 0 : i32
    %c0_i32_1 = arith.constant 0 : i32
    return %c0_i32, %c0_i32_0 : i32, i32
  }
  func.func @transform_2(%arg0: i32) -> (i32, i32) {
    %c0_i32 = arith.constant 0 : i32
    %c0_i32_0 = arith.constant 0 : i32
    %c0_i32_1 = arith.constant 0 : i32
    return %c0_i32, %c0_i32_0 : i32, i32
  }
  func.func @transform_3(%arg0: i32) -> (i32, i32) {
    %c0_i32 = arith.constant 0 : i32
    %c0_i32_0 = arith.constant 0 : i32
    %c0_i32_1 = arith.constant 0 : i32
    return %c0_i32, %c0_i32_0 : i32, i32
  }
  func.func @transform_4(%arg0: i32) -> (i32, i32) {
    %c0_i32 = arith.constant 0 : i32
    %c0_i32_0 = arith.constant 0 : i32
    %c0_i32_1 = arith.constant 0 : i32
    return %c0_i32, %c0_i32_0 : i32, i32
  }
  func.func @transform_5(%arg0: i32) -> (i32, i32) {
    %c0_i32 = arith.constant 0 : i32
    %c0_i32_0 = arith.constant 0 : i32
    return %arg0, %c0_i32 : i32, i32
  }
}

</mosaic_0001>

<bundles_post_ra>
// kernel: tpu_custom_call.1
= control target key start
LH: loop header
LB: loop body
LE: loop exit
PB: predicated region body
PF: predicated region fallthrough
CT: control target
= control target key end

     0   :  { %10 = vsyncpa [#allocation3], 0  ;;  %s639_s0 = inlined_call_operand.hbm [shape: f32[8,128], index: 0, kind: input, shape index: {}]   ;;  %s640_s1 = inlined_call_operand.hbm [shape: f32[128,128], index: 1, kind: input, shape index: {}]   ;;  %s641_s2 = inlined_call_operand.vmem [shape: f32[1,128], index: 2, kind: input, shape index: {}]   ;;  %s642_s3 = inlined_call_operand.hbm [shape: f32[128,128], index: 3, kind: input, shape index: {}]   ;;  %s643_s4 = inlined_call_operand.vmem [shape: f32[1,128], index: 4, kind: input, shape index: {}]   ;;  %s644_s5 = inlined_call_operand.hbm [shape: f32[8,128], index: 5, kind: output, shape index: {}]  }
   0x1   :  { %11 = vsyncpa [#allocation6], 0 }
   0x2   :  { %12 = vsyncpa [#allocation4], 0  ;;  %s524_s18 = smov [#allocation5]   ;;  %s430_s22 = scalar_lea.hbm %s640_s1, 2048 }
   0x3   :  { %s28_s19 = sshll.u32 %s524_s18, 4  ;;  %p431_p0 = scmp.ne.s32.totalorder %s640_s1, %s430_s22  ;;  %s29_s19 = int_to_ptr.vmem [resolvable:$true] %s28_s19 }
   0x4   :  { %p434_p1 = scmp.lt.u32.totalorder %s430_s22, %s640_s1 }
   0x6   :  { %p436_p2 = pnand %p434_p1, %p431_p0 }
   0x8   :  { %439 = shalt.err (!%p436_p2)
}
   0x9   :  { %s440_s27 = scalar_lea.vmem %s29_s19, 2048  ;;  %p445_p4 = scmp.lt.s32.totalorder %s29_s19, %s29_s19 }
   0xa   :  { %p441_p3 = scmp.ne.s32.totalorder %s29_s19, %s440_s27  ;;  %p446_p5 = scmp.lt.s32.totalorder %s440_s27, %s440_s27 }
   0xc   :  { %p447_p6 = por %p446_p5, %p445_p4 }
   0xe   :  { %p448_p7 = pnand %p447_p6, %p441_p3 }
  0x10   :  { %451 = shalt.err (!%p448_p7)
}
  0x11   :  { %s525_s28 = smov 128   ;;  %s526_s29 = smov 8  }
  0x12   :  { %34 = dma.hbm_to_vmem [thread:$0]  %s640_s1, 2048, %s29_s19, [#allocation6], %s525_s28, %s525_s28, %s526_s29  }
  0x13   :  { %s527_s7 = smov [#allocation2]   ;;  %s528_s9 = smov [#allocation7]  }
  0x14   :  { %s19_s8 = sshll.u32 %s527_s7, 4  ;;  %s42_s10 = sshll.u32 %s528_s9, 4  ;;  %s20_s8 = int_to_ptr.vmem [resolvable:$true] %s19_s8  ;;  %s43_s10 = int_to_ptr.vmem [resolvable:$true] %s42_s10 }
  0x15   :  { %s452_s13 = scalar_lea.hbm %s639_s0, 128 }
  0x16   :  { %p453_p8 = scmp.ne.s32.totalorder %s639_s0, %s452_s13  ;;  %p456_p9 = scmp.lt.u32.totalorder %s452_s13, %s639_s0 }
  0x18   :  { %p458_p10 = pnand %p456_p9, %p453_p8 }
  0x1a   :  { %461 = shalt.err (!%p458_p10)
}
  0x1b   :  { %s462_s1 = scalar_lea.vmem %s20_s8, 128  ;;  %p467_p12 = scmp.lt.s32.totalorder %s20_s8, %s20_s8 }
  0x1c   :  { %p463_p11 = scmp.ne.s32.totalorder %s20_s8, %s462_s1  ;;  %p468_p13 = scmp.lt.s32.totalorder %s462_s1, %s462_s1 }
  0x1e   :  { %p469_p0 = por %p468_p13, %p467_p12 }
  0x20   :  { %p470_p1 = pnand %p469_p0, %p463_p11 }
  0x22   :  { %473 = shalt.err (!%p470_p1)
}
  0x23   :  { %22 = dma.hbm_to_vmem [thread:$0]  %s639_s0, 128, %s20_s8, [#allocation3]  }
  0x24   :  { %s474_s22 = scalar_lea.hbm %s642_s3, 2048 }
  0x25   :  { %p475_p2 = scmp.ne.s32.totalorder %s642_s3, %s474_s22  ;;  %p478_p3 = scmp.lt.u32.totalorder %s474_s22, %s642_s3 }
  0x27   :  { %p480_p4 = pnand %p478_p3, %p475_p2 }
  0x29   :  { %483 = shalt.err (!%p480_p4)
}
  0x2a   :  { %s484_s27 = scalar_lea.vmem %s43_s10, 2048  ;;  %p489_p6 = scmp.lt.s32.totalorder %s43_s10, %s43_s10 }
  0x2b   :  { %p485_p5 = scmp.ne.s32.totalorder %s43_s10, %s484_s27  ;;  %p490_p7 = scmp.lt.s32.totalorder %s484_s27, %s484_s27 }
  0x2d   :  { %p491_p8 = por %p490_p7, %p489_p6 }
  0x2f   :  { %p492_p9 = pnand %p491_p8, %p485_p5 }
  0x31   :  { %495 = shalt.err (!%p492_p9)
}
  0x32   :  { %48 = dma.hbm_to_vmem [thread:$0]  %s642_s3, 2048, %s43_s10, [#allocation6], %s525_s28, %s525_s28, %s526_s29  }
  0x33   :  { %518 = dma.done.wait [#allocation3], 128  }
  0x34   :  { %519 = vsyncadd [#allocation3], 4294967168 }
  0x35   :  { %520 = dma.done.wait [#allocation6], 4096  }
  0x36   :  { %521 = vsyncadd [#allocation6], 4294963200  ;;  %v529_v0 = vmov 0.0|0.0   ;;  %vm530_vm0 = vmmov 0   ;;  %v531_v1 = vmov 0.0   ;;  %v61_v2 = vld [vmem:[#allocation5] sm:$0xff] }
  0x37   :  { %371 = vmatprep.subr.bf16.mxu0 %v529_v0  ;;  %333 = vmatprep.mubr.msk.f32.mxu0 %vm530_vm0, %v531_v1  ;;  %v62_v3 = vld [vmem:[#allocation5 + $0x8] sm:$0xff]  ;;  %v63_v4 = vld [vmem:[#allocation5 + $0x10] sm:$0xff]  ;;  %v64_v6 = vld [vmem:[#allocation5 + $0x18] sm:$0xff]  ;;  %s532_s7 = smov [#allocation8]  }
  0x38   :  { %395 = vmatprep.subr.bf16.mxu1 %v529_v0  ;;  %368 = vmatprep.mubr.msk.f32.mxu1 %vm530_vm0, %v531_v1  ;;  %v372_v5 = vpack.c.bf16 %v62_v3, %v61_v2  ;;  %v375_v7 = vpack.c.bf16 %v64_v6, %v63_v4  ;;  %v65_v8 = vld [vmem:[#allocation5 + $0x20] sm:$0xff]  ;;  %v66_v9 = vld [vmem:[#allocation5 + $0x28] sm:$0xff]  ;;  %v157_v12 = vld [vmem:[#allocation7 + $0x10] sm:$0xff]  ;;  %s255_s8 = sshll.u32 %s532_s7, 4  ;;  %s256_s8 = int_to_ptr.vmem [resolvable:$true] %s255_s8 }
  0x39   :  { %v155_v10 = vld [vmem:[#allocation7] sm:$0xff]  ;;  %v156_v11 = vld [vmem:[#allocation7 + $0x8] sm:$0xff]  ;;  %v158_v13 = vld [vmem:[#allocation7 + $0x18] sm:$0xff]  ;;  %v378_v14 = vpack.c.bf16 %v66_v9, %v65_v8  ;;  %s496_s9 = scalar_lea.vmem %s256_s8, 128  ;;  %p501_p11 = scmp.lt.s32.totalorder %s256_s8, %s256_s8 }
  0x3a   :  { %373 = vmatpush3.bf16.msra.mxu0 %v372_v5  ;;  %v396_v15 = vpack.c.bf16 %v156_v11, %v155_v10  ;;  %v67_v16 = vld [vmem:[#allocation5 + $0x30] sm:$0xff]  ;;  %v68_v17 = vld [vmem:[#allocation5 + $0x38] sm:$0xff]  ;;  %v399_v18 = vpack.c.bf16 %v158_v13, %v157_v12  ;;  %v159_v19 = vld [vmem:[#allocation7 + $0x20] sm:$0xff]  ;;  %p497_p10 = scmp.ne.s32.totalorder %s256_s8, %s496_s9  ;;  %p502_p12 = scmp.lt.s32.totalorder %s496_s9, %s496_s9 }
  0x3b   :  { %374 = vmatprep.subr.bf16.mxu0 %v529_v0  ;;  %v160_v20 = vld [vmem:[#allocation7 + $0x28] sm:$0xff]  ;;  %v381_v21 = vpack.c.bf16 %v68_v17, %v67_v16  ;;  %v69_v22 = vld [vmem:[#allocation5 + $0x40] sm:$0xff]  ;;  %v161_v25 = vld [vmem:[#allocation7 + $0x30] sm:$0xff] }
  0x3c   :  { %397 = vmatpush3.bf16.msra.mxu1 %v396_v15  ;;  %v70_v23 = vld [vmem:[#allocation5 + $0x48] sm:$0xff]  ;;  %v402_v24 = vpack.c.bf16 %v160_v20, %v159_v19  ;;  %v162_v26 = vld [vmem:[#allocation7 + $0x38] sm:$0xff]  ;;  %v71_v28 = vld [vmem:[#allocation5 + $0x50] sm:$0xff]  ;;  %p503_p13 = por %p502_p12, %p501_p11 }
  0x3d   :  { %398 = vmatprep.subr.bf16.mxu1 %v529_v0  ;;  %v384_v27 = vpack.c.bf16 %v70_v23, %v69_v22  ;;  %v72_v29 = vld [vmem:[#allocation5 + $0x58] sm:$0xff]  ;;  %v405_v30 = vpack.c.bf16 %v162_v26, %v161_v25  ;;  %v163_v31 = vld [vmem:[#allocation7 + $0x40] sm:$0xff]  ;;  %v164_v32 = vld [vmem:[#allocation7 + $0x48] sm:$0xff] }
  0x3e   :  { %376 = vmatpush3.bf16.msra.mxu0 %v375_v7  ;;  %v387_v33 = vpack.c.bf16 %v72_v29, %v71_v28  ;;  %v73_v34 = vld [vmem:[#allocation5 + $0x60] sm:$0xff]  ;;  %v74_v35 = vld [vmem:[#allocation5 + $0x68] sm:$0xff]  ;;  %v408_v36 = vpack.c.bf16 %v164_v32, %v163_v31  ;;  %v75_v38 = vld [vmem:[#allocation5 + $0x70] sm:$0xff]  ;;  %p504_p0 = pnand %p503_p13, %p497_p10 }
  0x3f   :  { %377 = vmatprep.subr.bf16.mxu0 %v529_v0  ;;  %v390_v37 = vpack.c.bf16 %v74_v35, %v73_v34  ;;  %v76_v39 = vld [vmem:[#allocation5 + $0x78] sm:$0xff]  ;;  %v165_v42 = vld [vmem:[#allocation7 + $0x50] sm:$0xff]  ;;  %v167_v45 = vld [vmem:[#allocation7 + $0x60] sm:$0xff] }
  0x40   :  { %400 = vmatpush3.bf16.msra.mxu1 %v399_v18  ;;  %v393_v40 = vpack.c.bf16 %v76_v39, %v75_v38  ;;  %v60_v41 = vld [vmem:[#allocation2] sm:$0xff]  ;;  %v168_v46 = vld [vmem:[#allocation7 + $0x68] sm:$0xff]  ;;  %v169_v48 = vld [vmem:[#allocation7 + $0x70] sm:$0xff] }
  0x41   :  { %401 = vmatprep.subr.bf16.mxu1 %v529_v0  ;;  %v166_v43 = vld [vmem:[#allocation7 + $0x58] sm:$0xff]  ;;  %v414_v47 = vpack.c.bf16 %v168_v46, %v167_v45 }
  0x42   :  { %379 = vmatpush3.bf16.msra.mxu0 %v378_v14  ;;  %v411_v44 = vpack.c.bf16 %v166_v43, %v165_v42  ;;  %v170_v49 = vld [vmem:[#allocation7 + $0x78] sm:$0xff] }
  0x43   :  { %380 = vmatprep.subr.bf16.mxu0 %v529_v0  ;;  %v417_v50 = vpack.c.bf16 %v170_v49, %v169_v48  ;;  %v265_v51 = vld [vmem:[%s641_s2] ss:$0 sm:$0xff] }
  0x44   :  { %403 = vmatpush3.bf16.msra.mxu1 %v402_v24  ;;  %v266_v56 = vld [vmem:[%s643_s4] ss:$0 sm:$0xff] }
  0x45   :  { %404 = vmatprep.subr.bf16.mxu1 %v529_v0 }
  0x46   :  { %382 = vmatpush3.bf16.msra.mxu0 %v381_v21 }
  0x47   :  { %383 = vmatprep.subr.bf16.mxu0 %v529_v0 }
  0x48   :  { %406 = vmatpush3.bf16.msra.mxu1 %v405_v30 }
  0x49   :  { %407 = vmatprep.subr.bf16.mxu1 %v529_v0 }
  0x4a   :  { %385 = vmatpush3.bf16.msra.mxu0 %v384_v27 }
  0x4b   :  { %386 = vmatprep.subr.bf16.mxu0 %v529_v0 }
  0x4c   :  { %409 = vmatpush3.bf16.msra.mxu1 %v408_v36 }
  0x4d   :  { %410 = vmatprep.subr.bf16.mxu1 %v529_v0 }
  0x4e   :  { %388 = vmatpush3.bf16.msra.mxu0 %v387_v33 }
  0x4f   :  { %389 = vmatprep.subr.bf16.mxu0 %v529_v0 }
  0x50   :  { %412 = vmatpush3.bf16.msra.mxu1 %v411_v44 }
  0x51   :  { %413 = vmatprep.subr.bf16.mxu1 %v529_v0 }
  0x52   :  { %391 = vmatpush3.bf16.msra.mxu0 %v390_v37 }
  0x53   :  { %392 = vmatprep.subr.bf16.mxu0 %v529_v0 }
  0x54   :  { %415 = vmatpush3.bf16.msra.mxu1 %v414_v47 }
  0x55   :  { %416 = vmatprep.subr.bf16.mxu1 %v529_v0 }
  0x56   :  { %394 = vmatpush3.bf16.msra.mxu0 %v393_v40 }
  0x58   :  { %418 = vmatpush3.bf16.msra.mxu1 %v417_v50 }
  0x59   :  { %334 = vmatmul.mubr.f32.vlgmr.msra.gmra.mrb[0].mxu0 %v60_v41 }
 0x12c   :  { %v150_v52 = vpop.f32.mrb[0].mxu0 }
 0x12d   :  { %v151_v53 = vadd.f32 %v265_v51, %v150_v52  ;;  %v335_v54 = vpop.f32.mrb[1].mxu0 }
 0x12f   :  { %428 = vtanh.f32 %v151_v53 }
 0x139   :  { %v429_v55 = vpop.eup %428 }
 0x13a   :  { %369 = vmatmul.mubr.f32.vlgmr.msra.gmra.mrb[0].mxu1 %v429_v55 }
 0x20d   :  { %v244_v57 = vpop.f32.mrb[0].mxu1 }
 0x20e   :  { %v245_v58 = vadd.f32 %v266_v56, %v244_v57  ;;  %v370_v59 = vpop.f32.mrb[1].mxu1 }
 0x210   :  { %248 = vst [vmem:[#allocation8] sm:$0xff] %v245_v58 }
 0x211   :  { %507 = shalt.err (!%p504_p0)
}
 0x212   :  { %s508_s11 = scalar_lea.hbm %s644_s5, 128 }
 0x213   :  { %p509_p1 = scmp.ne.s32.totalorder %s644_s5, %s508_s11  ;;  %p512_p2 = scmp.lt.u32.totalorder %s508_s11, %s644_s5 }
 0x215   :  { %p514_p3 = pnand %p512_p2, %p509_p1 }
 0x217   :  { %517 = shalt.err (!%p514_p3)
}
 0x218   :  { %258 = dma.vmem_to_hbm [thread:$0]  %s256_s8, 128, %s644_s5, [#allocation4]  }
 0x219   :  { %522 = dma.done.wait [#allocation4], 128  }
 0x21a   :  { %523 = vsyncadd [#allocation4], 4294967168 }
 0x21b   :  { %262 = vsyncpa [#allocation3], 1 }
 0x21c   :  { %263 = vsyncpa [#allocation6], 1 }
 0x21d   :  { %264 = vsyncpa [#allocation4], 1 }

// kernel: tpu_custom_call.1
= control target key start
LH: loop header
LB: loop body
LE: loop exit
PB: predicated region body
PF: predicated region fallthrough
CT: control target
= control target key end

     0   :  { %10 = vsyncpa [#allocation3], 0  ;;  %s639_s0 = inlined_call_operand.hbm [shape: f32[8,128], index: 0, kind: input, shape index: {}]   ;;  %s640_s1 = inlined_call_operand.hbm [shape: f32[128,128], index: 1, kind: input, shape index: {}]   ;;  %s641_s2 = inlined_call_operand.vmem [shape: f32[1,128], index: 2, kind: input, shape index: {}]   ;;  %s642_s3 = inlined_call_operand.hbm [shape: f32[128,128], index: 3, kind: input, shape index: {}]   ;;  %s643_s4 = inlined_call_operand.vmem [shape: f32[1,128], index: 4, kind: input, shape index: {}]   ;;  %s644_s5 = inlined_call_operand.hbm [shape: f32[8,128], index: 5, kind: output, shape index: {}]  }
   0x1   :  { %11 = vsyncpa [#allocation6], 0 }
   0x2   :  { %12 = vsyncpa [#allocation4], 0  ;;  %s524_s18 = smov [#allocation5]   ;;  %s430_s22 = scalar_lea.hbm %s640_s1, 2048 }
   0x3   :  { %s28_s19 = sshll.u32 %s524_s18, 4  ;;  %p431_p0 = scmp.ne.s32.totalorder %s640_s1, %s430_s22  ;;  %s29_s19 = int_to_ptr.vmem [resolvable:$true] %s28_s19 }
   0x4   :  { %p434_p1 = scmp.lt.u32.totalorder %s430_s22, %s640_s1 }
   0x6   :  { %p436_p2 = pnand %p434_p1, %p431_p0 }
   0x8   :  { %439 = shalt.err (!%p436_p2)
}
   0x9   :  { %s440_s27 = scalar_lea.vmem %s29_s19, 2048  ;;  %p445_p4 = scmp.lt.s32.totalorder %s29_s19, %s29_s19 }
   0xa   :  { %p441_p3 = scmp.ne.s32.totalorder %s29_s19, %s440_s27  ;;  %p446_p5 = scmp.lt.s32.totalorder %s440_s27, %s440_s27 }
   0xc   :  { %p447_p6 = por %p446_p5, %p445_p4 }
   0xe   :  { %p448_p7 = pnand %p447_p6, %p441_p3 }
  0x10   :  { %451 = shalt.err (!%p448_p7)
}
  0x11   :  { %s525_s28 = smov 128   ;;  %s526_s29 = smov 8  }
  0x12   :  { %34 = dma.hbm_to_vmem [thread:$0]  %s640_s1, 2048, %s29_s19, [#allocation6], %s525_s28, %s525_s28, %s526_s29  }
  0x13   :  { %s527_s7 = smov [#allocation2]   ;;  %s528_s9 = smov [#allocation7]  }
  0x14   :  { %s19_s8 = sshll.u32 %s527_s7, 4  ;;  %s42_s10 = sshll.u32 %s528_s9, 4  ;;  %s20_s8 = int_to_ptr.vmem [resolvable:$true] %s19_s8  ;;  %s43_s10 = int_to_ptr.vmem [resolvable:$true] %s42_s10 }
  0x15   :  { %s452_s13 = scalar_lea.hbm %s639_s0, 128 }
  0x16   :  { %p453_p8 = scmp.ne.s32.totalorder %s639_s0, %s452_s13  ;;  %p456_p9 = scmp.lt.u32.totalorder %s452_s13, %s639_s0 }
  0x18   :  { %p458_p10 = pnand %p456_p9, %p453_p8 }
  0x1a   :  { %461 = shalt.err (!%p458_p10)
}
  0x1b   :  { %s462_s1 = scalar_lea.vmem %s20_s8, 128  ;;  %p467_p12 = scmp.lt.s32.totalorder %s20_s8, %s20_s8 }
  0x1c   :  { %p463_p11 = scmp.ne.s32.totalorder %s20_s8, %s462_s1  ;;  %p468_p13 = scmp.lt.s32.totalorder %s462_s1, %s462_s1 }
  0x1e   :  { %p469_p0 = por %p468_p13, %p467_p12 }
  0x20   :  { %p470_p1 = pnand %p469_p0, %p463_p11 }
  0x22   :  { %473 = shalt.err (!%p470_p1)
}
  0x23   :  { %22 = dma.hbm_to_vmem [thread:$0]  %s639_s0, 128, %s20_s8, [#allocation3]  }
  0x24   :  { %s474_s22 = scalar_lea.hbm %s642_s3, 2048 }
  0x25   :  { %p475_p2 = scmp.ne.s32.totalorder %s642_s3, %s474_s22  ;;  %p478_p3 = scmp.lt.u32.totalorder %s474_s22, %s642_s3 }
  0x27   :  { %p480_p4 = pnand %p478_p3, %p475_p2 }
  0x29   :  { %483 = shalt.err (!%p480_p4)
}
  0x2a   :  { %s484_s27 = scalar_lea.vmem %s43_s10, 2048  ;;  %p489_p6 = scmp.lt.s32.totalorder %s43_s10, %s43_s10 }
  0x2b   :  { %p485_p5 = scmp.ne.s32.totalorder %s43_s10, %s484_s27  ;;  %p490_p7 = scmp.lt.s32.totalorder %s484_s27, %s484_s27 }
  0x2d   :  { %p491_p8 = por %p490_p7, %p489_p6 }
  0x2f   :  { %p492_p9 = pnand %p491_p8, %p485_p5 }
  0x31   :  { %495 = shalt.err (!%p492_p9)
}
  0x32   :  { %48 = dma.hbm_to_vmem [thread:$0]  %s642_s3, 2048, %s43_s10, [#allocation6], %s525_s28, %s525_s28, %s526_s29  }
  0x33   :  { %518 = dma.done.wait [#allocation3], 128  }
  0x34   :  { %519 = vsyncadd [#allocation3], 4294967168 }
  0x35   :  { %520 = dma.done.wait [#allocation6], 4096  }
  0x36   :  { %521 = vsyncadd [#allocation6], 4294963200  ;;  %v529_v0 = vmov 0.0|0.0   ;;  %vm530_vm0 = vmmov 0   ;;  %v531_v1 = vmov 0.0   ;;  %v61_v2 = vld [vmem:[#allocation5] sm:$0xff] }
  0x37   :  { %371 = vmatprep.subr.bf16.mxu0 %v529_v0  ;;  %333 = vmatprep.mubr.msk.f32.mxu0 %vm530_vm0, %v531_v1  ;;  %v62_v3 = vld [vmem:[#allocation5 + $0x8] sm:$0xff]  ;;  %v63_v4 = vld [vmem:[#allocation5 + $0x10] sm:$0xff]  ;;  %v64_v6 = vld [vmem:[#allocation5 + $0x18] sm:$0xff]  ;;  %s532_s7 = smov [#allocation8]  }
  0x38   :  { %395 = vmatprep.subr.bf16.mxu1 %v529_v0  ;;  %368 = vmatprep.mubr.msk.f32.mxu1 %vm530_vm0, %v531_v1  ;;  %v372_v5 = vpack.c.bf16 %v62_v3, %v61_v2  ;;  %v375_v7 = vpack.c.bf16 %v64_v6, %v63_v4  ;;  %v65_v8 = vld [vmem:[#allocation5 + $0x20] sm:$0xff]  ;;  %v66_v9 = vld [vmem:[#allocation5 + $0x28] sm:$0xff]  ;;  %v157_v12 = vld [vmem:[#allocation7 + $0x10] sm:$0xff]  ;;  %s255_s8 = sshll.u32 %s532_s7, 4  ;;  %s256_s8 = int_to_ptr.vmem [resolvable:$true] %s255_s8 }
  0x39   :  { %v155_v10 = vld [vmem:[#allocation7] sm:$0xff]  ;;  %v156_v11 = vld [vmem:[#allocation7 + $0x8] sm:$0xff]  ;;  %v158_v13 = vld [vmem:[#allocation7 + $0x18] sm:$0xff]  ;;  %v378_v14 = vpack.c.bf16 %v66_v9, %v65_v8  ;;  %s496_s9 = scalar_lea.vmem %s256_s8, 128  ;;  %p501_p11 = scmp.lt.s32.totalorder %s256_s8, %s256_s8 }
  0x3a   :  { %373 = vmatpush3.bf16.msra.mxu0 %v372_v5  ;;  %v396_v15 = vpack.c.bf16 %v156_v11, %v155_v10  ;;  %v67_v16 = vld [vmem:[#allocation5 + $0x30] sm:$0xff]  ;;  %v68_v17 = vld [vmem:[#allocation5 + $0x38] sm:$0xff]  ;;  %v399_v18 = vpack.c.bf16 %v158_v13, %v157_v12  ;;  %v159_v19 = vld [vmem:[#allocation7 + $0x20] sm:$0xff]  ;;  %p497_p10 = scmp.ne.s32.totalorder %s256_s8, %s496_s9  ;;  %p502_p12 = scmp.lt.s32.totalorder %s496_s9, %s496_s9 }
  0x3b   :  { %374 = vmatprep.subr.bf16.mxu0 %v529_v0  ;;  %v160_v20 = vld [vmem:[#allocation7 + $0x28] sm:$0xff]  ;;  %v381_v21 = vpack.c.bf16 %v68_v17, %v67_v16  ;;  %v69_v22 = vld [vmem:[#allocation5 + $0x40] sm:$0xff]  ;;  %v161_v25 = vld [vmem:[#allocation7 + $0x30] sm:$0xff] }
  0x3c   :  { %397 = vmatpush3.bf16.msra.mxu1 %v396_v15  ;;  %v70_v23 = vld [vmem:[#allocation5 + $0x48] sm:$0xff]  ;;  %v402_v24 = vpack.c.bf16 %v160_v20, %v159_v19  ;;  %v162_v26 = vld [vmem:[#allocation7 + $0x38] sm:$0xff]  ;;  %v71_v28 = vld [vmem:[#allocation5 + $0x50] sm:$0xff]  ;;  %p503_p13 = por %p502_p12, %p501_p11 }
  0x3d   :  { %398 = vmatprep.subr.bf16.mxu1 %v529_v0  ;;  %v384_v27 = vpack.c.bf16 %v70_v23, %v69_v22  ;;  %v72_v29 = vld [vmem:[#allocation5 + $0x58] sm:$0xff]  ;;  %v405_v30 = vpack.c.bf16 %v162_v26, %v161_v25  ;;  %v163_v31 = vld [vmem:[#allocation7 + $0x40] sm:$0xff]  ;;  %v164_v32 = vld [vmem:[#allocation7 + $0x48] sm:$0xff] }
  0x3e   :  { %376 = vmatpush3.bf16.msra.mxu0 %v375_v7  ;;  %v387_v33 = vpack.c.bf16 %v72_v29, %v71_v28  ;;  %v73_v34 = vld [vmem:[#allocation5 + $0x60] sm:$0xff]  ;;  %v74_v35 = vld [vmem:[#allocation5 + $0x68] sm:$0xff]  ;;  %v408_v36 = vpack.c.bf16 %v164_v32, %v163_v31  ;;  %v75_v38 = vld [vmem:[#allocation5 + $0x70] sm:$0xff]  ;;  %p504_p0 = pnand %p503_p13, %p497_p10 }
  0x3f   :  { %377 = vmatprep.subr.bf16.mxu0 %v529_v0  ;;  %v390_v37 = vpack.c.bf16 %v74_v35, %v73_v34  ;;  %v76_v39 = vld [vmem:[#allocation5 + $0x78] sm:$0xff]  ;;  %v165_v42 = vld [vmem:[#allocation7 + $0x50] sm:$0xff]  ;;  %v167_v45 = vld [vmem:[#allocation7 + $0x60] sm:$0xff] }
  0x40   :  { %400 = vmatpush3.bf16.msra.mxu1 %v399_v18  ;;  %v393_v40 = vpack.c.bf16 %v76_v39, %v75_v38  ;;  %v60_v41 = vld [vmem:[#allocation2] sm:$0xff]  ;;  %v168_v46 = vld [vmem:[#allocation7 + $0x68] sm:$0xff]  ;;  %v169_v48 = vld [vmem:[#allocation7 + $0x70] sm:$0xff] }
  0x41   :  { %401 = vmatprep.subr.bf16.mxu1 %v529_v0  ;;  %v166_v43 = vld [vmem:[#allocation7 + $0x58] sm:$0xff]  ;;  %v414_v47 = vpack.c.bf16 %v168_v46, %v167_v45 }
  0x42   :  { %379 = vmatpush3.bf16.msra.mxu0 %v378_v14  ;;  %v411_v44 = vpack.c.bf16 %v166_v43, %v165_v42  ;;  %v170_v49 = vld [vmem:[#allocation7 + $0x78] sm:$0xff] }
  0x43   :  { %380 = vmatprep.subr.bf16.mxu0 %v529_v0  ;;  %v417_v50 = vpack.c.bf16 %v170_v49, %v169_v48  ;;  %v265_v51 = vld [vmem:[%s641_s2] ss:$0 sm:$0xff] }
  0x44   :  { %403 = vmatpush3.bf16.msra.mxu1 %v402_v24  ;;  %v266_v56 = vld [vmem:[%s643_s4] ss:$0 sm:$0xff] }
  0x45   :  { %404 = vmatprep.subr.bf16.mxu1 %v529_v0 }
  0x46   :  { %382 = vmatpush3.bf16.msra.mxu0 %v381_v21 }
  0x47   :  { %383 = vmatprep.subr.bf16.mxu0 %v529_v0 }
  0x48   :  { %406 = vmatpush3.bf16.msra.mxu1 %v405_v30 }
  0x49   :  { %407 = vmatprep.subr.bf16.mxu1 %v529_v0 }
  0x4a   :  { %385 = vmatpush3.bf16.msra.mxu0 %v384_v27 }
  0x4b   :  { %386 = vmatprep.subr.bf16.mxu0 %v529_v0 }
  0x4c   :  { %409 = vmatpush3.bf16.msra.mxu1 %v408_v36 }
  0x4d   :  { %410 = vmatprep.subr.bf16.mxu1 %v529_v0 }
  0x4e   :  { %388 = vmatpush3.bf16.msra.mxu0 %v387_v33 }
  0x4f   :  { %389 = vmatprep.subr.bf16.mxu0 %v529_v0 }
  0x50   :  { %412 = vmatpush3.bf16.msra.mxu1 %v411_v44 }
  0x51   :  { %413 = vmatprep.subr.bf16.mxu1 %v529_v0 }
  0x52   :  { %391 = vmatpush3.bf16.msra.mxu0 %v390_v37 }
  0x53   :  { %392 = vmatprep.subr.bf16.mxu0 %v529_v0 }
  0x54   :  { %415 = vmatpush3.bf16.msra.mxu1 %v414_v47 }
  0x55   :  { %416 = vmatprep.subr.bf16.mxu1 %v529_v0 }
  0x56   :  { %394 = vmatpush3.bf16.msra.mxu0 %v393_v40 }
  0x58   :  { %418 = vmatpush3.bf16.msra.mxu1 %v417_v50 }
  0x59   :  { %334 = vmatmul.mubr.f32.vlgmr.msra.gmra.mrb[0].mxu0 %v60_v41 }
 0x12c   :  { %v150_v52 = vpop.f32.mrb[0].mxu0 }
 0x12d   :  { %v151_v53 = vadd.f32 %v265_v51, %v150_v52  ;;  %v335_v54 = vpop.f32.mrb[1].mxu0 }
 0x12f   :  { %428 = vtanh.f32 %v151_v53 }
 0x139   :  { %v429_v55 = vpop.eup %428 }
 0x13a   :  { %369 = vmatmul.mubr.f32.vlgmr.msra.gmra.mrb[0].mxu1 %v429_v55 }
 0x20d   :  { %v244_v57 = vpop.f32.mrb[0].mxu1 }
 0x20e   :  { %v245_v58 = vadd.f32 %v266_v56, %v244_v57  ;;  %v370_v59 = vpop.f32.mrb[1].mxu1 }
 0x210   :  { %248 = vst [vmem:[#allocation8] sm:$0xff] %v245_v58 }
 0x211   :  { %507 = shalt.err (!%p504_p0)
}
 0x212   :  { %s508_s11 = scalar_lea.hbm %s644_s5, 128 }
 0x213   :  { %p509_p1 = scmp.ne.s32.totalorder %s644_s5, %s508_s11  ;;  %p512_p2 = scmp.lt.u32.totalorder %s508_s11, %s644_s5 }
 0x215   :  { %p514_p3 = pnand %p512_p2, %p509_p1 }
 0x217   :  { %517 = shalt.err (!%p514_p3)
}
 0x218   :  { %258 = dma.vmem_to_hbm [thread:$0]  %s256_s8, 128, %s644_s5, [#allocation4]  }
 0x219   :  { %522 = dma.done.wait [#allocation4], 128  }
 0x21a   :  { %523 = vsyncadd [#allocation4], 4294967168 }
 0x21b   :  { %262 = vsyncpa [#allocation3], 1 }
 0x21c   :  { %263 = vsyncpa [#allocation6], 1 }
 0x21d   :  { %264 = vsyncpa [#allocation4], 1 }

</bundles_post_ra>
